<compile_context>
chip_gen: v6e
topology: v6e:2x2x1
jax: 0.10.0
libtpu: 0.0.40
codegen_flags: <defaults>
</compile_context>

<pallas_src>
import functools

import jax
import jax.numpy as jnp
from jax import lax
from jax.experimental import pallas as pl
from jax.experimental.pallas import tpu as pltpu

LANES = 128
SUBLANES = 8
MAX_TILE_ROWS = 2048  # 2048 x 128 x 4B = 1 MiB per input per grid step


def _round_up(x, m):
    return ((x + m - 1) // m) * m


# ---------------------------------------------------------------------------
# Fused micro-IoU kernel: streams tp / fp / fn tiles, folds each tile into
# small (8,128) accumulators, reduces + divides once in the finalize step.
# ---------------------------------------------------------------------------
def _iou_kernel(tp_ref, fp_ref, fn_ref, out_ref, acc_tp, acc_rest, *, rows, tm):
    i = pl.program_id(0)

    @pl.when(i == 0)
    def _init():
        acc_tp[...] = jnp.zeros_like(acc_tp)
        acc_rest[...] = jnp.zeros_like(acc_rest)

    def _accumulate(mask):
        tp = tp_ref[...].astype(jnp.float32)
        rest = fp_ref[...].astype(jnp.float32) + fn_ref[...].astype(jnp.float32)
        if mask is not None:
            tp = jnp.where(mask, tp, 0.0)
            rest = jnp.where(mask, rest, 0.0)
        # Fold (tm,128) -> (8,128).  The reshape matches the native (8,128)
        # sublane tiling, so the sum over the leading axis is pure VPU adds
        # (no XLU) and keeps scratch independent of the tile size.
        acc_tp[...] += tp.reshape(tm // SUBLANES, SUBLANES, LANES).sum(axis=0)
        acc_rest[...] += rest.reshape(tm // SUBLANES, SUBLANES, LANES).sum(axis=0)

    if rows % tm != 0:
        # The last grid block extends past the array; its out-of-bounds rows
        # hold unspecified data, so mask them before accumulating.  Only the
        # last step pays for the mask (VPU has slack there anyway).
        is_last = i == pl.num_programs(0) - 1

        @pl.when(jnp.logical_not(is_last))
        def _full():
            _accumulate(None)

        @pl.when(is_last)
        def _partial():
            ridx = i * tm + lax.broadcasted_iota(jnp.int32, (tm, LANES), 0)
            _accumulate(ridx < rows)
    else:
        _accumulate(None)

    @pl.when(i == pl.num_programs(0) - 1)
    def _finalize():
        tp_sum = jnp.sum(acc_tp[...], keepdims=True)             # (1, 1)
        denom = tp_sum + jnp.sum(acc_rest[...], keepdims=True)   # (1, 1)
        # smp zero_division default -> 1.0 when tp + fp + fn == 0
        out_ref[...] = jnp.where(denom > 0.0, tp_sum / denom, jnp.float32(1.0))


def _to_lane_dense(x, padded_elems):
    flat = x.reshape(-1)  # free view
    pad = padded_elems - flat.shape[0]
    if pad:
        # Only hit when the size is not a multiple of 8*128 (<= 1023 zeros);
        # zero padding is exact for sums.
        # TODO(synk): for huge non-128-aligned inputs this is still one extra
        # HBM pass; a 1-D layout with element-granular in-kernel masking would
        # remove it, at the cost of trickier lowering.
        flat = jnp.pad(flat, (0, pad))
    return flat.reshape(padded_elems // LANES, LANES)


def iou_score_micro(tp, fp, fn, tn=None, *, max_tile_rows=MAX_TILE_ROWS):
    """smp.metrics.iou_score(tp, fp, fn, tn, reduction='micro') forward pass."""
    del tn  # not used by the IoU formula
    max_tile_rows = max(SUBLANES, (max_tile_rows // SUBLANES) * SUBLANES)

    total = tp.size
    padded_elems = max(_round_up(total, SUBLANES * LANES), SUBLANES * LANES)
    rows = padded_elems // LANES          # multiple of 8
    tm = min(max_tile_rows, rows)         # multiple of 8
    grid = pl.cdiv(rows, tm)

    tp2d = _to_lane_dense(tp, padded_elems)
    fp2d = _to_lane_dense(fp, padded_elems)
    fn2d = _to_lane_dense(fn, padded_elems)

    kernel = functools.partial(_iou_kernel, rows=rows, tm=tm)

    out = pl.pallas_call(
        kernel,
        out_shape=jax.ShapeDtypeStruct((1, 1), jnp.float32),
        grid_spec=pltpu.PrefetchScalarGridSpec(
            num_scalar_prefetch=0,
            grid=(grid,),
            in_specs=[
                pl.BlockSpec((tm, LANES), lambda i: (i, 0)),
                pl.BlockSpec((tm, LANES), lambda i: (i, 0)),
                pl.BlockSpec((tm, LANES), lambda i: (i, 0)),
            ],
            out_specs=pl.BlockSpec((1, 1), lambda i: (0, 0)),
            scratch_shapes=[
                pltpu.VMEM((SUBLANES, LANES), jnp.float32),
                pltpu.VMEM((SUBLANES, LANES), jnp.float32),
            ],
        ),
        compiler_params=pltpu.CompilerParams(
            dimension_semantics=("arbitrary",)),
    )(tp2d, fp2d, fn2d)
    return out[0, 0]


# ---------------------------------------------------------------------------
# Pure-JAX reference for verification
# ---------------------------------------------------------------------------
def _reference(tp, fp, fn, tn):
    del tn
    tp_s = jnp.sum(tp.astype(jnp.float32))
    fp_s = jnp.sum(fp.astype(jnp.float32))
    fn_s = jnp.sum(fn.astype(jnp.float32))
    denom = tp_s + fp_s + fn_s
    return jnp.where(denom > 0.0, tp_s / denom, jnp.float32(1.0))


if __name__ == "__main__":
    key = jax.random.PRNGKey(0)
    k1, k2, k3, k4 = jax.random.split(key, 4)

    # Stats tensors as produced by smp.metrics.get_stats: (batch, num_classes).
    N, C = 2, 4
    tp = jax.random.randint(k1, (N, C), 0, 200, dtype=jnp.int32)
    fp = jax.random.randint(k2, (N, C), 0, 60, dtype=jnp.int32)
    fn = jax.random.randint(k3, (N, C), 0, 60, dtype=jnp.int32)
    tn = jax.random.randint(k4, (N, C), 0, 500, dtype=jnp.int32)

    score = jax.block_until_ready(iou_score_micro(tp, fp, fn, tn))
    ref = _reference(tp, fp, fn, tn)
    assert jnp.allclose(score, ref, rtol=1e-5, atol=1e-6), (score, ref)

    # Also exercise the multi-block + partial-last-block (masked) path with a
    # small per-pixel-style stats tensor and an artificially small tile.
    shape = (2, 4, 24, 24)
    tp2 = jax.random.randint(k1, shape, 0, 3, dtype=jnp.int32)
    fp2 = jax.random.randint(k2, shape, 0, 3, dtype=jnp.int32)
    fn2 = jax.random.randint(k3, shape, 0, 3, dtype=jnp.int32)
    tn2 = jax.random.randint(k4, shape, 0, 3, dtype=jnp.int32)
    score2 = jax.block_until_ready(
        iou_score_micro(tp2, fp2, fn2, tn2, max_tile_rows=16))
    ref2 = _reference(tp2, fp2, fn2, tn2)
    assert jnp.allclose(score2, ref2, rtol=1e-5, atol=1e-6), (score2, ref2)

    print("KERNEL_OK")
</pallas_src>

<mosaic_0001>
module attributes {stable_mosaic.version = 11 : i64} {
  func.func @_iou_kernel(%arg0: i32, %arg1: memref<8x128xi32, #tpu.memory_space<vmem>>, %arg2: memref<8x128xi32, #tpu.memory_space<vmem>>, %arg3: memref<8x128xi32, #tpu.memory_space<vmem>>, %arg4: memref<1x1xf32, #tpu.memory_space<vmem>>, %arg5: memref<8x128xf32, #tpu.memory_space<vmem>>, %arg6: memref<8x128xf32, #tpu.memory_space<vmem>>) attributes {dimension_semantics = [#tpu.dimension_semantics<arbitrary>], iteration_bounds = array<i64: 1>, scalar_prefetch = 0 : i64, scratch_operands = 2 : i64, tpu.core_type = #tpu.core_type<tc>, window_params = [{transform_indices = @transform_0, window_bounds = array<i64: 8, 128>}, {transform_indices = @transform_1, window_bounds = array<i64: 8, 128>}, {transform_indices = @transform_2, window_bounds = array<i64: 8, 128>}, {pipeline_mode = #tpu.pipeline_mode<synchronous>, transform_indices = @transform_3, window_bounds = array<i64: 1, 1>}]} {
    %c0_i32 = arith.constant 0 : i32
    %0 = arith.cmpi eq, %arg0, %c0_i32 : i32
    %1 = arith.extui %0 : i1 to i32
    %c0_i32_0 = arith.constant 0 : i32
    %2 = arith.cmpi ne, %1, %c0_i32_0 : i32
    scf.if %2 {
      %cst_17 = arith.constant 0.000000e+00 : f32
      %23 = vector.broadcast %cst_17 : f32 to vector<8x128xf32>
      %c0_18 = arith.constant 0 : index
      %c0_19 = arith.constant 0 : index
      %24 = vector.load %arg5[%c0_18, %c0_19] : memref<8x128xf32, #tpu.memory_space<vmem>>, vector<8x128xf32>
      tpu.vector_store %arg5[%c0_18, %c0_19], %23 {strides = array<i32>} : memref<8x128xf32, #tpu.memory_space<vmem>>, vector<8x128xf32>,
      %cst_20 = arith.constant 0.000000e+00 : f32
      %25 = vector.broadcast %cst_20 : f32 to vector<8x128xf32>
      %c0_21 = arith.constant 0 : index
      %c0_22 = arith.constant 0 : index
      %26 = vector.load %arg6[%c0_21, %c0_22] : memref<8x128xf32, #tpu.memory_space<vmem>>, vector<8x128xf32>
      tpu.vector_store %arg6[%c0_21, %c0_22], %25 {strides = array<i32>} : memref<8x128xf32, #tpu.memory_space<vmem>>, vector<8x128xf32>,
    } else {
    }
    %c0 = arith.constant 0 : index
    %c0_1 = arith.constant 0 : index
    %3 = vector.load %arg1[%c0, %c0_1] : memref<8x128xi32, #tpu.memory_space<vmem>>, vector<8x128xi32>
    %4 = arith.sitofp %3 : vector<8x128xi32> to vector<8x128xf32>
    %c0_2 = arith.constant 0 : index
    %c0_3 = arith.constant 0 : index
    %5 = vector.load %arg2[%c0_2, %c0_3] : memref<8x128xi32, #tpu.memory_space<vmem>>, vector<8x128xi32>
    %6 = arith.sitofp %5 : vector<8x128xi32> to vector<8x128xf32>
    %c0_4 = arith.constant 0 : index
    %c0_5 = arith.constant 0 : index
    %7 = vector.load %arg3[%c0_4, %c0_5] : memref<8x128xi32, #tpu.memory_space<vmem>>, vector<8x128xi32>
    %8 = arith.sitofp %7 : vector<8x128xi32> to vector<8x128xf32>
    %9 = arith.addf %6, %8 : vector<8x128xf32>
    %c0_6 = arith.constant 0 : index
    %c0_7 = arith.constant 0 : index
    %10 = vector.load %arg5[%c0_6, %c0_7] : memref<8x128xf32, #tpu.memory_space<vmem>>, vector<8x128xf32>
    %11 = vector.shape_cast %4 : vector<8x128xf32> to vector<1x8x128xf32>
    %cst = arith.constant dense<0.000000e+00> : vector<8x128xf32>
    %12 = vector.multi_reduction <add>, %11, %cst [0] : vector<1x8x128xf32> to vector<8x128xf32>
    %13 = arith.addf %10, %12 : vector<8x128xf32>
    %c0_8 = arith.constant 0 : index
    %c0_9 = arith.constant 0 : index
    %14 = vector.load %arg5[%c0_8, %c0_9] : memref<8x128xf32, #tpu.memory_space<vmem>>, vector<8x128xf32>
    tpu.vector_store %arg5[%c0_8, %c0_9], %13 {strides = array<i32>} : memref<8x128xf32, #tpu.memory_space<vmem>>, vector<8x128xf32>,
    %c0_10 = arith.constant 0 : index
    %c0_11 = arith.constant 0 : index
    %15 = vector.load %arg6[%c0_10, %c0_11] : memref<8x128xf32, #tpu.memory_space<vmem>>, vector<8x128xf32>
    %16 = vector.shape_cast %9 : vector<8x128xf32> to vector<1x8x128xf32>
    %cst_12 = arith.constant dense<0.000000e+00> : vector<8x128xf32>
    %17 = vector.multi_reduction <add>, %16, %cst_12 [0] : vector<1x8x128xf32> to vector<8x128xf32>
    %18 = arith.addf %15, %17 : vector<8x128xf32>
    %c0_13 = arith.constant 0 : index
    %c0_14 = arith.constant 0 : index
    %19 = vector.load %arg6[%c0_13, %c0_14] : memref<8x128xf32, #tpu.memory_space<vmem>>, vector<8x128xf32>
    tpu.vector_store %arg6[%c0_13, %c0_14], %18 {strides = array<i32>} : memref<8x128xf32, #tpu.memory_space<vmem>>, vector<8x128xf32>,
    %c0_i32_15 = arith.constant 0 : i32
    %20 = arith.cmpi eq, %arg0, %c0_i32_15 : i32
    %21 = arith.extui %20 : i1 to i32
    %c0_i32_16 = arith.constant 0 : i32
    %22 = arith.cmpi ne, %21, %c0_i32_16 : i32
    scf.if %22 {
      %c0_17 = arith.constant 0 : index
      %c0_18 = arith.constant 0 : index
      %23 = vector.load %arg5[%c0_17, %c0_18] : memref<8x128xf32, #tpu.memory_space<vmem>>, vector<8x128xf32>
      %24 = vector.shape_cast %23 : vector<8x128xf32> to vector<1x8x128xf32>
      %cst_19 = arith.constant dense<0.000000e+00> : vector<1xf32>
      %25 = vector.multi_reduction <add>, %24, %cst_19 [1, 2] : vector<1x8x128xf32> to vector<1xf32>
      %26 = vector.shape_cast %25 : vector<1xf32> to vector<1x1x1xf32>
      %27 = vector.extract %26[0, 0, 0] : f32 from vector<1x1x1xf32>
      %28 = vector.broadcast %27 : f32 to vector<1x1xf32>
      %c0_20 = arith.constant 0 : index
      %c0_21 = arith.constant 0 : index
      %29 = vector.load %arg6[%c0_20, %c0_21] : memref<8x128xf32, #tpu.memory_space<vmem>>, vector<8x128xf32>
      %30 = vector.shape_cast %29 : vector<8x128xf32> to vector<1x8x128xf32>
      %cst_22 = arith.constant dense<0.000000e+00> : vector<1xf32>
      %31 = vector.multi_reduction <add>, %30, %cst_22 [1, 2] : vector<1x8x128xf32> to vector<1xf32>
      %32 = vector.shape_cast %31 : vector<1xf32> to vector<1x1x1xf32>
      %33 = vector.extract %32[0, 0, 0] : f32 from vector<1x1x1xf32>
      %34 = vector.broadcast %33 : f32 to vector<1x1xf32>
      %35 = arith.addf %28, %34 : vector<1x1xf32>
      %cst_23 = arith.constant 0.000000e+00 : f32
      %36 = vector.broadcast %cst_23 : f32 to vector<1x1xf32>
      %37 = arith.cmpf ogt, %35, %36 : vector<1x1xf32>
      %38 = arith.divf %28, %35 : vector<1x1xf32>
      %cst_24 = arith.constant 1.000000e+00 : f32
      %39 = vector.broadcast %cst_24 : f32 to vector<1x1xf32>
      %40 = arith.select %37, %38, %39 : vector<1x1xi1>, vector<1x1xf32>
      %c0_25 = arith.constant 0 : index
      %c0_26 = arith.constant 0 : index
      %41 = vector.load %arg4[%c0_25, %c0_26] : memref<1x1xf32, #tpu.memory_space<vmem>>, vector<1x1xf32>
      tpu.vector_store %arg4[%c0_25, %c0_26], %40 {strides = array<i32>} : memref<1x1xf32, #tpu.memory_space<vmem>>, vector<1x1xf32>,
    } else {
    }
    return
  }
  func.func @transform_0(%arg0: i32) -> (i32, i32) {
    %c0_i32 = arith.constant 0 : i32
    %c0_i32_0 = arith.constant 0 : i32
    return %arg0, %c0_i32 : i32, i32
  }
  func.func @transform_1(%arg0: i32) -> (i32, i32) {
    %c0_i32 = arith.constant 0 : i32
    %c0_i32_0 = arith.constant 0 : i32
    return %arg0, %c0_i32 : i32, i32
  }
  func.func @transform_2(%arg0: i32) -> (i32, i32) {
    %c0_i32 = arith.constant 0 : i32
    %c0_i32_0 = arith.constant 0 : i32
    return %arg0, %c0_i32 : i32, i32
  }
  func.func @transform_3(%arg0: i32) -> (i32, i32) {
    %c0_i32 = arith.constant 0 : i32
    %c0_i32_0 = arith.constant 0 : i32
    %c0_i32_1 = arith.constant 0 : i32
    return %c0_i32, %c0_i32_0 : i32, i32
  }
}

</mosaic_0001>

<bundles_post_ra>
// kernel: tpu_custom_call.1
= control target key start
LH: loop header
LB: loop body
LE: loop exit
PB: predicated region body
PF: predicated region fallthrough
CT: control target
= control target key end

     0   :  { %8 = vsyncpa [#allocation5], 0  ;;  %s251_s0 = inlined_call_operand.hbm [shape: s32[8,128], index: 0, kind: input, shape index: {}]   ;;  %s252_s1 = inlined_call_operand.hbm [shape: s32[8,128], index: 1, kind: input, shape index: {}]   ;;  %s253_s2 = inlined_call_operand.hbm [shape: s32[8,128], index: 2, kind: input, shape index: {}]   ;;  %s254_s3 = inlined_call_operand.hbm [shape: f32[1,1], index: 3, kind: output, shape index: {}]  }
   0x1   :  { %9 = vsyncpa [#allocation8], 0 }
   0x2   :  { %10 = vsyncpa [#allocation6], 0  ;;  %s215_s12 = smov [#allocation7]   ;;  %s216_s14 = smov [#allocation4]  }
   0x3   :  { %s27_s13 = sshll.u32 %s215_s12, 4  ;;  %s17_s15 = sshll.u32 %s216_s14, 4  ;;  %s28_s13 = int_to_ptr.vmem [resolvable:$true] %s27_s13  ;;  %s18_s15 = int_to_ptr.vmem [resolvable:$true] %s17_s15 }
   0x4   :  { %s137_s16 = scalar_lea.vmem %s28_s13, 128  ;;  %p142_p1 = scmp.lt.s32.totalorder %s28_s13, %s28_s13 }
   0x5   :  { %p138_p0 = scmp.ne.s32.totalorder %s28_s13, %s137_s16  ;;  %p143_p2 = scmp.lt.s32.totalorder %s137_s16, %s137_s16 }
   0x7   :  { %p144_p3 = por %p143_p2, %p142_p1 }
   0x9   :  { %p145_p4 = pnand %p144_p3, %p138_p0 }
   0xb   :  { %148 = shalt.err (!%p145_p4)
}
   0xc   :  { %30 = dma.hbm_to_vmem [thread:$0]  %s252_s1, 128, %s28_s13, [#allocation8]  }
   0xd   :  { %s157_s19 = scalar_lea.vmem %s18_s15, 128  ;;  %p162_p6 = scmp.lt.s32.totalorder %s18_s15, %s18_s15 }
   0xe   :  { %p158_p5 = scmp.ne.s32.totalorder %s18_s15, %s157_s19  ;;  %p163_p7 = scmp.lt.s32.totalorder %s157_s19, %s157_s19 }
  0x10   :  { %p164_p8 = por %p163_p7, %p162_p6 }
  0x12   :  { %p165_p9 = pnand %p164_p8, %p158_p5 }
  0x14   :  { %168 = shalt.err (!%p165_p9)
}
  0x15   :  { %20 = dma.hbm_to_vmem [thread:$0]  %s251_s0, 128, %s18_s15, [#allocation5]  }
  0x16   :  { %s217_s22 = smov [#allocation9]  }
  0x17   :  { %s37_s23 = sshll.u32 %s217_s22, 4  ;;  %s38_s23 = int_to_ptr.vmem [resolvable:$true] %s37_s23 }
  0x18   :  { %s177_s24 = scalar_lea.vmem %s38_s23, 128  ;;  %p182_p11 = scmp.lt.s32.totalorder %s38_s23, %s38_s23 }
  0x19   :  { %p178_p10 = scmp.ne.s32.totalorder %s38_s23, %s177_s24  ;;  %p183_p12 = scmp.lt.s32.totalorder %s177_s24, %s177_s24 }
  0x1b   :  { %p184_p13 = por %p183_p12, %p182_p11 }
  0x1d   :  { %p185_p0 = pnand %p184_p13, %p178_p10 }
  0x1f   :  { %188 = shalt.err (!%p185_p0)
}
  0x20   :  { %40 = dma.hbm_to_vmem [thread:$0]  %s253_s2, 128, %s38_s23, [#allocation8]  }
  0x21   :  { %209 = dma.done.wait [#allocation5], 128  }
  0x22   :  { %210 = vsyncadd [#allocation5], 4294967168 }
  0x23   :  { %211 = dma.done.wait [#allocation8], 256  }
  0x24   :  { %212 = vsyncadd [#allocation8], 4294967040  ;;  %v56_v0 = vld [vmem:[#allocation4] sm:$0xff]  ;;  %v58_v1 = vld [vmem:[#allocation7] sm:$0xff]  ;;  %s218_s26 = smov [#allocation10]   ;;  %vm101_vm0 = vcmask 0  }
  0x25   :  { %v60_v2 = vld [vmem:[#allocation9] sm:$0xff]  ;;  %v57_v3 = vcvt.s32.f32 %v56_v0  ;;  %v59_v4 = vcvt.s32.f32 %v58_v1  ;;  %s109_s27 = sshll.u32 %s218_s26, 4  ;;  %s110_s27 = int_to_ptr.vmem [resolvable:$true] %s109_s27 }
  0x26   :  { %v61_v5 = vcvt.s32.f32 %v60_v2  ;;  %s189_s28 = scalar_lea.vmem %s110_s27, 16  ;;  %s193_s29 = scalar_lea.vmem %s110_s27, 32 }
  0x27   :  { %75 = vadd.xlane.f32.xlu0 %v57_v3  ;;  %p190_p1 = scmp.ne.s32.totalorder %s110_s27, %s189_s28  ;;  %p194_p2 = scmp.lt.s32.totalorder %s110_s27, %s110_s27 }
  0x28   :  { %v62_v6 = vadd.f32 %v61_v5, %v59_v4  ;;  %p195_p3 = scmp.lt.s32.totalorder %s193_s29, %s189_s28 }
  0x2a   :  { %p196_p4 = por %p195_p3, %p194_p2 }
  0x2b   :  { %86 = vadd.xlane.f32.xlu0 %v62_v6 }
  0x2c   :  { %p197_p5 = pnand %p196_p4, %p190_p1 }
  0xb0   :  { %v76_v7 = vpop.xlane.xlu0 %75 }
  0xb1   :  { %v77_v8 = vrot.slane %v76_v7, 4 }
  0xb3   :  { %v78_v9 = vadd.f32 %v77_v8, %v76_v7 }
  0xb4   :  { %v87_v10 = vpop.xlane.xlu0 %86 }
  0xb5   :  { %v79_v11 = vrot.slane %v78_v9, 2  ;;  %v88_v12 = vrot.slane %v87_v10, 4 }
  0xb7   :  { %v89_v13 = vadd.f32 %v88_v12, %v87_v10  ;;  %v80_v14 = vadd.f32 %v79_v11, %v78_v9 }
  0xb9   :  { %v90_v15 = vrot.slane %v89_v13, 2  ;;  %v81_v16 = vrot.slane %v80_v14, 1 }
  0xbb   :  { %v91_v17 = vadd.f32 %v90_v15, %v89_v13  ;;  %v82_v18 = vadd.f32 %v81_v16, %v80_v14 }
  0xbd   :  { %119 = vpush %v82_v18  ;;  %v92_v19 = vrot.slane %v91_v17, 1 }
  0xbf   :  { %v93_v20 = vadd.f32 %v92_v19, %v91_v17 }
  0xc1   :  { %121 = vpush %v93_v20 }
  0xee   :  { %s120_s0 = spop %119 }
  0xef   :  { %v84_v21 = vstv %s120_s0 }
  0xf2   :  { %s122_s2 = spop %121 }
  0xf3   :  { %v95_v22 = vstv %s122_s2 }
  0xf4   :  { %v96_v23 = vadd.f32 %v95_v22, %v84_v21 }
  0xf6   :  { %127 = vrcp.f32 %v96_v23  ;;  %vm97_vm1 = vcmp.gt.f32.partialorder %v96_v23, 0.0 }
 0x103   :  { %v128_v24 = vpop.eup %127 }
 0x104   :  { %v99_v25 = vmul.f32 %v128_v24, %v84_v21 }
 0x106   :  { %v100_v26 = vsel %vm97_vm1, %v99_v25, 1.0 }
 0x107   :  { %102 = vst.msk [vmem:[#allocation10] sm:$0x1] %vm101_vm0, %v100_v26 }
 0x108   :  { %200 = shalt.err (!%p197_p5)
}
 0x109   :  { %112 = dma.vmem_to_hbm [thread:$0]  %s110_s27, 16, %s254_s3, [#allocation6]  }
 0x10a   :  { %213 = dma.done.wait [#allocation6], 16  }
 0x10b   :  { %214 = vsyncadd [#allocation6], 4294967280 }
 0x10c   :  { %116 = vsyncpa [#allocation5], 1 }
 0x10d   :  { %117 = vsyncpa [#allocation8], 1 }
 0x10e   :  { %118 = vsyncpa [#allocation6], 1 }

</bundles_post_ra>
